<compile_context>
chip_gen: v6e
topology: v6e:2x2x1
jax: 0.10.0
libtpu: 0.0.40
codegen_flags: <defaults>
</compile_context>

<pallas_src>
import jax
import jax.numpy as jnp
from jax.experimental import pallas as pl
from jax.experimental.pallas import tpu as pltpu


LANE = 128
ACC_ROWS = 32          # partial-sum tile = 4 f32 vregs: (32, 128)
MAX_ROW_TILE = 4096    # 4096 x 128 x 4B = 2 MiB / input / pipeline buffer
# TODO(synk): bump MAX_ROW_TILE to 8192 on v7x (faster HBM, 32 MiB scoped VMEM)
# once chip detection via pltpu.get_tpu_info() is wired in; 4096 is the safe
# cap for v5e's 16 MiB default scoped VMEM.
TWO_PI = 6.283185307179586
INV_TWO_PI = 1.0 / TWO_PI


def _make_kernel(row_tile, acc_rows, n_valid_rows, needs_mask):
    groups = row_tile // acc_rows

    def kernel(pred_ref, true_ref, out_ref):
        # Cast after the DMA so bf16/f16 inputs stream at native width.
        d = true_ref[...].astype(jnp.float32) - pred_ref[...].astype(jnp.float32)
        # Transcendental-free wrap to [-pi, pi]: same magnitude as
        # atan2(sin d, cos d), so the square matches.  VPU only; EUP untouched.
        wrapped = d - TWO_PI * jnp.round(d * INV_TWO_PI)
        sq = wrapped * wrapped
        if needs_mask:
            # The last grid step is a partial block: rows >= n_valid_rows hold
            # undefined data -> zero them before accumulating.  (Static guard:
            # this code is not emitted when row_tile divides the row count.)
            row_ids = (pl.program_id(0) * row_tile
                       + jax.lax.broadcasted_iota(jnp.int32, (row_tile, LANE), 0))
            sq = jnp.where(row_ids < n_valid_rows, sq, 0.0)
        # Fold (row_tile, LANE) -> (groups, acc_rows, LANE); summing the leading
        # axis is plain VPU adds into 4 vregs (no XLU, no scalar chain).
        out_ref[0, :, :] = jnp.sum(sq.reshape(groups, acc_rows, LANE), axis=0)

    return kernel


@jax.jit
def custom_loss(pred_y, true_y):
    """Mean squared wrapped angular error, matching the PyTorch CustomLoss."""
    assert pred_y.shape == true_y.shape
    n = pred_y.size

    pred_flat = jnp.ravel(pred_y)
    true_flat = jnp.ravel(true_y)

    rows = pl.cdiv(n, LANE)
    lane_pad = rows * LANE - n
    if lane_pad:
        # TODO(synk): mask the ragged sub-128 lane tail in-kernel instead of
        # this (O(n)-copying) pad; padded zeros wrap to zero so the sum is exact.
        pred_flat = jnp.pad(pred_flat, (0, lane_pad))
        true_flat = jnp.pad(true_flat, (0, lane_pad))

    pred2d = pred_flat.reshape(rows, LANE)   # free bitcast of the ravel
    true2d = true_flat.reshape(rows, LANE)

    if rows >= ACC_ROWS:
        acc_rows = ACC_ROWS
        # Multiple of ACC_ROWS (hence of 8 sublanes and 16 for bf16 tiling),
        # never larger than the array, capped at the VMEM-friendly max.
        row_tile = min(MAX_ROW_TILE, (rows // ACC_ROWS) * ACC_ROWS)
    else:
        # Tiny input: a single full-array block (full dims bypass the (8,128)
        # divisibility rule), accumulated in one shot.
        acc_rows = rows
        row_tile = rows

    n_tiles = pl.cdiv(rows, row_tile)
    needs_mask = (rows % row_tile) != 0

    itemsize = pred_y.dtype.itemsize + true_y.dtype.itemsize

    partials = pl.pallas_call(
        _make_kernel(row_tile, acc_rows, rows, needs_mask),
        out_shape=jax.ShapeDtypeStruct((n_tiles, acc_rows, LANE), jnp.float32),
        grid_spec=pltpu.PrefetchScalarGridSpec(
            num_scalar_prefetch=0,
            grid=(n_tiles,),
            in_specs=[
                pl.BlockSpec((row_tile, LANE), lambda t: (t, 0)),
                pl.BlockSpec((row_tile, LANE), lambda t: (t, 0)),
            ],
            out_specs=pl.BlockSpec((1, acc_rows, LANE), lambda t: (t, 0, 0)),
        ),
        compiler_params=pltpu.CompilerParams(
            # Independent per-tile partials -> fully parallel grid axis; shards
            # across the 2 TensorCores on v7x, plain loop on v5e/v6e.
            dimension_semantics=("parallel",),
        ),
        cost_estimate=pl.CostEstimate(
            flops=6 * n,
            transcendentals=0,
            bytes_accessed=itemsize * n + 4 * n_tiles * acc_rows * LANE,
        ),
    )(pred2d, true2d)

    # Tiny final reduce over the (n_tiles, acc_rows, 128) partial sums.
    return jnp.sum(partials) / jnp.float32(n)


if __name__ == "__main__":
    key = jax.random.PRNGKey(0)
    k1, k2 = jax.random.split(key)

    # Orientation predictions/targets (angles in radians), batch 2 x 4 x 16 x 16.
    shape = (2, 4, 16, 16)
    pred_y = jax.random.uniform(k1, shape, jnp.float32, minval=-jnp.pi, maxval=jnp.pi)
    true_y = jax.random.uniform(k2, shape, jnp.float32, minval=-jnp.pi, maxval=jnp.pi)

    loss = custom_loss(pred_y, true_y)
    jax.block_until_ready(loss)

    # Pure-JAX reference check (original atan2(sin, cos) formulation).
    diff = true_y - pred_y
    ref = jnp.mean(jnp.arctan2(jnp.sin(diff), jnp.cos(diff)) ** 2)
    assert jnp.allclose(loss, ref, rtol=1e-5, atol=1e-5), (loss, ref)

    print("KERNEL_OK")
</pallas_src>

<mosaic_0001>
module attributes {stable_mosaic.version = 11 : i64} {
  func.func @kernel(%arg0: i32, %arg1: memref<16x128xf32, #tpu.memory_space<vmem>>, %arg2: memref<16x128xf32, #tpu.memory_space<vmem>>, %arg3: memref<1x16x128xf32, #tpu.memory_space<vmem>>) attributes {dimension_semantics = [#tpu.dimension_semantics<parallel>], iteration_bounds = array<i64: 1>, scalar_prefetch = 0 : i64, scratch_operands = 0 : i64, tpu.core_type = #tpu.core_type<tc>, window_params = [{transform_indices = @transform_0, window_bounds = array<i64: 16, 128>}, {transform_indices = @transform_1, window_bounds = array<i64: 16, 128>}, {transform_indices = @transform_2, window_bounds = array<i64: 1, 16, 128>}]} {
    %c0 = arith.constant 0 : index
    %c0_0 = arith.constant 0 : index
    %0 = vector.load %arg2[%c0, %c0_0] : memref<16x128xf32, #tpu.memory_space<vmem>>, vector<16x128xf32>
    %c0_1 = arith.constant 0 : index
    %c0_2 = arith.constant 0 : index
    %1 = vector.load %arg1[%c0_1, %c0_2] : memref<16x128xf32, #tpu.memory_space<vmem>>, vector<16x128xf32>
    %2 = arith.subf %0, %1 : vector<16x128xf32>
    %cst = arith.constant 0.159154937 : f32
    %3 = vector.broadcast %cst : f32 to vector<16x128xf32>
    %4 = arith.mulf %2, %3 : vector<16x128xf32>
    %5 = math.roundeven %4 : vector<16x128xf32>
    %cst_3 = arith.constant 6.28318548 : f32
    %6 = vector.broadcast %cst_3 : f32 to vector<16x128xf32>
    %7 = arith.mulf %6, %5 : vector<16x128xf32>
    %8 = arith.subf %2, %7 : vector<16x128xf32>
    %9 = arith.mulf %8, %8 : vector<16x128xf32>
    %10 = vector.shape_cast %9 : vector<16x128xf32> to vector<1x16x128xf32>
    %cst_4 = arith.constant dense<0.000000e+00> : vector<16x128xf32>
    %11 = vector.multi_reduction <add>, %10, %cst_4 [0] : vector<1x16x128xf32> to vector<16x128xf32>
    %c0_5 = arith.constant 0 : index
    %c0_6 = arith.constant 0 : index
    %c0_7 = arith.constant 0 : index
    %12 = vector.load %arg3[%c0_5, %c0_6, %c0_7] : memref<1x16x128xf32, #tpu.memory_space<vmem>>, vector<1x16x128xf32>
    %13 = vector.shape_cast %12 : vector<1x16x128xf32> to vector<16x128xf32>
    %14 = vector.shape_cast %11 : vector<16x128xf32> to vector<1x16x128xf32>
    tpu.vector_store %arg3[%c0_5, %c0_6, %c0_7], %14 {strides = array<i32>} : memref<1x16x128xf32, #tpu.memory_space<vmem>>, vector<1x16x128xf32>,
    return
  }
  func.func @transform_0(%arg0: i32) -> (i32, i32) {
    %c0_i32 = arith.constant 0 : i32
    %c0_i32_0 = arith.constant 0 : i32
    return %arg0, %c0_i32 : i32, i32
  }
  func.func @transform_1(%arg0: i32) -> (i32, i32) {
    %c0_i32 = arith.constant 0 : i32
    %c0_i32_0 = arith.constant 0 : i32
    return %arg0, %c0_i32 : i32, i32
  }
  func.func @transform_2(%arg0: i32) -> (i32, i32, i32) {
    %c0_i32 = arith.constant 0 : i32
    %c0_i32_0 = arith.constant 0 : i32
    %c0_i32_1 = arith.constant 0 : i32
    return %arg0, %c0_i32, %c0_i32_0 : i32, i32, i32
  }
}

</mosaic_0001>

<bundles_post_ra>
// kernel: custom_loss.1
= control target key start
LH: loop header
LB: loop body
LE: loop exit
PB: predicated region body
PF: predicated region fallthrough
CT: control target
= control target key end

     0   :  { %s84_s0 = inlined_call_operand.vmem [shape: f32[16,128], index: 0, kind: input, shape index: {}]   ;;  %s85_s1 = inlined_call_operand.vmem [shape: f32[16,128], index: 1, kind: input, shape index: {}]   ;;  %s86_s2 = inlined_call_operand.vmem [shape: f32[1,16,128], index: 2, kind: output, shape index: {}]  }
   0x1   :  { %v11_v0 = vld [vmem:[%s85_s1] sm:$0xff]  ;;  %v12_v2 = vld [vmem:[%s85_s1 + $0x8] sm:$0xff] }
   0x2   :  { %v13_v1 = vld [vmem:[%s84_s0] sm:$0xff]  ;;  %v14_v4 = vld [vmem:[%s84_s0 + $0x8] sm:$0xff] }
   0x3   :  { %v15_v3 = vsub.f32 %v11_v0, %v13_v1  ;;  %v16_v5 = vsub.f32 %v12_v2, %v14_v4 }
   0x5   :  { %v17_v6 = vmul.f32 0.15915494, %v15_v3  ;;  %v18_v7 = vmul.f32 0.15915494, %v16_v5 }
   0x7   :  { %v37_v8 = vcvt.f32.s32 %v17_v6  ;;  %v35_v9 = vand.u32 2147483647, %v17_v6  ;;  %v45_v10 = vcvt.f32.s32 %v18_v7  ;;  %v40_v12 = vand.u32 2147483648, %v17_v6 }
   0x8   :  { %v43_v13 = vand.u32 2147483647, %v18_v7  ;;  %v48_v15 = vand.u32 2147483648, %v18_v7 }
   0x9   :  { %v38_v11 = vcvt.s32.f32 %v37_v8  ;;  %v46_v14 = vcvt.s32.f32 %v45_v10  ;;  %vm36_vm0 = vcmp.lt.f32.partialorder %v35_v9, 8388608.0 }
   0xa   :  { %vm44_vm1 = vcmp.lt.f32.partialorder %v43_v13, 8388608.0 }
   0xb   :  { %v39_v16 = vand.u32 2147483647, %v38_v11  ;;  %v47_v17 = vand.u32 2147483647, %v46_v14 }
   0xd   :  { %v41_v18 = vor.u32 %v40_v12, %v39_v16  ;;  %v49_v19 = vor.u32 %v48_v15, %v47_v17 }
   0xf   :  { %v42_v20 = vsel %vm36_vm0, %v41_v18, %v17_v6  ;;  %v50_v22 = vsel %vm44_vm1, %v49_v19, %v18_v7 }
  0x10   :  { %v21_v21 = vmul.f32 6.2831855, %v42_v20  ;;  %v22_v23 = vmul.f32 6.2831855, %v50_v22 }
  0x12   :  { %v23_v24 = vsub.f32 %v15_v3, %v21_v21  ;;  %v24_v25 = vsub.f32 %v16_v5, %v22_v23 }
  0x14   :  { %v25_v26 = vmul.f32 %v23_v24, %v23_v24  ;;  %v26_v27 = vmul.f32 %v24_v25, %v24_v25 }
  0x16   :  { %29 = vst [vmem:[%s86_s2] sm:$0xff] %v25_v26  ;;  %30 = vst [vmem:[%s86_s2 + $0x8] sm:$0xff] %v26_v27 }

</bundles_post_ra>
